<compile_context>
chip_gen: v7x
topology: tpu7x:2x2x1
jax: 0.10.0
libtpu: 0.0.40
codegen_flags: <defaults>
</compile_context>

<pallas_src>
import functools

import jax
import jax.numpy as jnp
from jax.experimental import pallas as pl
from jax.experimental.pallas import tpu as pltpu

IN_FEATURES = 16
OUT_FEATURES = 4
N_LINEARS = 8
LANE = 128
DEFAULT_BLOCK_B = 32768  # batch rows (lanes) per grid step


def _toy_model_kernel(wt0_ref, bt0_ref, wts_ref, bts_ref, xt_ref, ot_ref):
    """One grid step: fold the 9 affine layers, apply them to one batch tile.

    wt0_ref: [4, 16]      W0^T                               (resident)
    bt0_ref: [4, 128]     b0^T replicated across lanes       (resident)
    wts_ref: [8, 4, 4]    Wi^T of the 8 4->4 linears         (resident)
    bts_ref: [8, 4, 128]  bi^T replicated across lanes       (resident)
    xt_ref:  [16, TB]     x^T tile (batch on lane axis -> dense loads)
    ot_ref:  [4, TB]      y^T tile (lane-dense stores)
    """
    # Affine composition on the tiny transposed weights:
    #   W^T <- Wi^T @ W^T ;  b^T <- Wi^T @ b^T + bi^T
    w_t = wt0_ref[...]                                      # [4, 16]
    b_t = bt0_ref[...]                                      # [4, 128]
    for i in range(N_LINEARS):                              # static unroll
        wi_t = wts_ref[i]                                   # [4, 4]
        w_t = jnp.dot(wi_t, w_t, preferred_element_type=jnp.float32)
        b_t = jnp.dot(wi_t, b_t, preferred_element_type=jnp.float32) + bts_ref[i]
    # Exactly one MXU matmul over the data per tile.
    yt = jnp.dot(w_t, xt_ref[...], preferred_element_type=jnp.float32)
    ot_ref[...] = (yt + b_t[:, 0:1]).astype(ot_ref.dtype)


@functools.partial(jax.jit, static_argnames=("block_b",))
def toy_model_forward(x, w0, b0, ws, bs, *, block_b=DEFAULT_BLOCK_B):
    """x: [B,16] f32; w0: [16,4]; b0: [1,4]; ws: [8,4,4]; bs: [8,4] ([in,out])."""
    B = x.shape[0]
    block_b = max(LANE, (block_b // LANE) * LANE)
    b_pad = pl.cdiv(B, LANE) * LANE
    tb = min(block_b, b_pad)
    b_pad = pl.cdiv(b_pad, tb) * tb
    grid = (b_pad // tb,)

    # Layout plumbing (tiny except the x transpose, which buys lane-dense
    # loads/compute/stores inside the kernel).
    xt = jnp.pad(x.T, ((0, 0), (0, b_pad - B)))                     # [16, B_pad]
    wt0 = w0.T                                                      # [4, 16]
    bt0 = jnp.broadcast_to(b0.reshape(OUT_FEATURES, 1), (OUT_FEATURES, LANE))
    wts = jnp.swapaxes(ws, 1, 2)                                    # [8, 4, 4]
    bts = jnp.broadcast_to(bs[:, :, None], (N_LINEARS, OUT_FEATURES, LANE))

    flops = (2 * OUT_FEATURES * IN_FEATURES * b_pad
             + grid[0] * N_LINEARS * 2 * OUT_FEATURES * OUT_FEATURES
             * (IN_FEATURES + LANE))
    bytes_accessed = 4 * ((IN_FEATURES + OUT_FEATURES) * b_pad
                          + IN_FEATURES * OUT_FEATURES
                          + (1 + N_LINEARS) * OUT_FEATURES * (1 + LANE))

    yt = pl.pallas_call(
        _toy_model_kernel,
        out_shape=jax.ShapeDtypeStruct((OUT_FEATURES, b_pad), jnp.float32),
        grid_spec=pltpu.PrefetchScalarGridSpec(
            num_scalar_prefetch=0,
            grid=grid,
            in_specs=[
                pl.BlockSpec((OUT_FEATURES, IN_FEATURES), lambda i: (0, 0)),
                pl.BlockSpec((OUT_FEATURES, LANE), lambda i: (0, 0)),
                pl.BlockSpec((N_LINEARS, OUT_FEATURES, OUT_FEATURES),
                             lambda i: (0, 0, 0)),
                pl.BlockSpec((N_LINEARS, OUT_FEATURES, LANE),
                             lambda i: (0, 0, 0)),
                pl.BlockSpec((IN_FEATURES, tb), lambda i: (0, i)),
            ],
            out_specs=pl.BlockSpec((OUT_FEATURES, tb), lambda i: (0, i)),
        ),
        compiler_params=pltpu.CompilerParams(
            dimension_semantics=("parallel",)),
        cost_estimate=pl.CostEstimate(
            flops=flops, transcendentals=0, bytes_accessed=bytes_accessed),
    )(wt0, bt0, wts, bts, xt)

    return yt[:, :B].T  # back to [B, 4]


def init_params(key):
    """Deterministic parameter init (PyTorch Linear-style uniform bounds)."""
    k0, k1, k2, k3 = jax.random.split(key, 4)
    bound0 = 1.0 / jnp.sqrt(IN_FEATURES)
    # Stored already transposed to [in, out] so y = x @ W + b.
    w0 = jax.random.uniform(k0, (IN_FEATURES, OUT_FEATURES),
                            minval=-bound0, maxval=bound0, dtype=jnp.float32)
    b0 = jax.random.uniform(k1, (1, OUT_FEATURES),
                            minval=-bound0, maxval=bound0, dtype=jnp.float32)
    bound = 1.0 / jnp.sqrt(OUT_FEATURES)
    ws = jax.random.uniform(k2, (N_LINEARS, OUT_FEATURES, OUT_FEATURES),
                            minval=-bound, maxval=bound, dtype=jnp.float32)
    bs = jax.random.uniform(k3, (N_LINEARS, OUT_FEATURES),
                            minval=-bound, maxval=bound, dtype=jnp.float32)
    return w0, b0, ws, bs


def reference_forward(x, w0, b0, ws, bs):
    """Unfolded layer-by-layer reference (matches the PyTorch module)."""
    hp = jax.lax.Precision.HIGHEST
    data = jnp.dot(x, w0, precision=hp) + b0
    for i in range(N_LINEARS):
        data = jnp.dot(data, ws[i], precision=hp) + bs[i][None, :]
    return data


if __name__ == "__main__":
    key = jax.random.PRNGKey(0)
    pkey, xkey1, xkey2 = jax.random.split(key, 3)
    w0, b0, ws, bs = init_params(pkey)

    # ToyModel.forward takes `inputs` and uses inputs[0]; model that as a tuple.
    batch = 8
    x = jax.random.normal(xkey1, (batch, IN_FEATURES), dtype=jnp.float32)
    inputs = (x,)

    out = jax.block_until_ready(toy_model_forward(inputs[0], w0, b0, ws, bs))
    ref = reference_forward(inputs[0], w0, b0, ws, bs)
    assert out.shape == (batch, OUT_FEATURES)
    assert jnp.allclose(out, ref, atol=2e-4, rtol=2e-4)

    # Also exercise the padded, multi-step-grid path (small block -> grid of 3).
    x_big = jax.random.normal(xkey2, (300, IN_FEATURES), dtype=jnp.float32)
    out_big = jax.block_until_ready(
        toy_model_forward(x_big, w0, b0, ws, bs, block_b=128))
    ref_big = reference_forward(x_big, w0, b0, ws, bs)
    assert out_big.shape == (300, OUT_FEATURES)
    assert jnp.allclose(out_big, ref_big, atol=2e-4, rtol=2e-4)

    print("KERNEL_OK")
</pallas_src>

<mosaic_0001>
module attributes {stable_mosaic.version = 11 : i64} {
  func.func @_toy_model_kernel(%arg0: i32, %arg1: memref<4x16xf32, #tpu.memory_space<vmem>>, %arg2: memref<4x128xf32, #tpu.memory_space<vmem>>, %arg3: memref<8x4x4xf32, #tpu.memory_space<vmem>>, %arg4: memref<8x4x128xf32, #tpu.memory_space<vmem>>, %arg5: memref<16x128xf32, #tpu.memory_space<vmem>>, %arg6: memref<4x128xf32, #tpu.memory_space<vmem>>) attributes {dimension_semantics = [#tpu.dimension_semantics<parallel>], iteration_bounds = array<i64: 1>, scalar_prefetch = 0 : i64, scratch_operands = 0 : i64, tpu.core_type = #tpu.core_type<tc>, window_params = [{pipeline_mode = #tpu.pipeline_mode<synchronous>, transform_indices = @transform_0, window_bounds = array<i64: 4, 16>}, {pipeline_mode = #tpu.pipeline_mode<synchronous>, transform_indices = @transform_1, window_bounds = array<i64: 4, 128>}, {pipeline_mode = #tpu.pipeline_mode<synchronous>, transform_indices = @transform_2, window_bounds = array<i64: 8, 4, 4>}, {pipeline_mode = #tpu.pipeline_mode<synchronous>, transform_indices = @transform_3, window_bounds = array<i64: 8, 4, 128>}, {transform_indices = @transform_4, window_bounds = array<i64: 16, 128>}, {transform_indices = @transform_5, window_bounds = array<i64: 4, 128>}]} {
    %c0 = arith.constant 0 : index
    %c0_0 = arith.constant 0 : index
    %0 = vector.load %arg1[%c0, %c0_0] : memref<4x16xf32, #tpu.memory_space<vmem>>, vector<4x16xf32>
    %c0_1 = arith.constant 0 : index
    %c0_2 = arith.constant 0 : index
    %1 = vector.load %arg2[%c0_1, %c0_2] : memref<4x128xf32, #tpu.memory_space<vmem>>, vector<4x128xf32>
    %c0_3 = arith.constant 0 : index
    %c0_4 = arith.constant 0 : index
    %c0_5 = arith.constant 0 : index
    %2 = vector.load %arg3[%c0_3, %c0_4, %c0_5] : memref<8x4x4xf32, #tpu.memory_space<vmem>>, vector<1x4x4xf32>
    %3 = vector.shape_cast %2 : vector<1x4x4xf32> to vector<4x4xf32>
    %cst = arith.constant dense<0.000000e+00> : vector<4x16xf32>
    %4 = tpu.matmul %3, %0, %cst {dimension_numbers = #tpu.dot_dimension_numbers<[1], [0], [0], [1], [0, 0, 1, 1], [], []>} : vector<4x4xf32>, vector<4x16xf32>, vector<4x16xf32> -> vector<4x16xf32>
    %cst_6 = arith.constant dense<0.000000e+00> : vector<4x128xf32>
    %5 = tpu.matmul %3, %1, %cst_6 {dimension_numbers = #tpu.dot_dimension_numbers<[1], [0], [0], [1], [0, 0, 1, 1], [], []>} : vector<4x4xf32>, vector<4x128xf32>, vector<4x128xf32> -> vector<4x128xf32>
    %c0_7 = arith.constant 0 : index
    %c0_8 = arith.constant 0 : index
    %c0_9 = arith.constant 0 : index
    %6 = vector.load %arg4[%c0_7, %c0_8, %c0_9] : memref<8x4x128xf32, #tpu.memory_space<vmem>>, vector<1x4x128xf32>
    %7 = vector.shape_cast %6 : vector<1x4x128xf32> to vector<4x128xf32>
    %8 = arith.addf %5, %7 : vector<4x128xf32>
    %c1 = arith.constant 1 : index
    %c0_10 = arith.constant 0 : index
    %c0_11 = arith.constant 0 : index
    %9 = vector.load %arg3[%c1, %c0_10, %c0_11] : memref<8x4x4xf32, #tpu.memory_space<vmem>>, vector<1x4x4xf32>
    %10 = vector.shape_cast %9 : vector<1x4x4xf32> to vector<4x4xf32>
    %cst_12 = arith.constant dense<0.000000e+00> : vector<4x16xf32>
    %11 = tpu.matmul %10, %4, %cst_12 {dimension_numbers = #tpu.dot_dimension_numbers<[1], [0], [0], [1], [0, 0, 1, 1], [], []>} : vector<4x4xf32>, vector<4x16xf32>, vector<4x16xf32> -> vector<4x16xf32>
    %cst_13 = arith.constant dense<0.000000e+00> : vector<4x128xf32>
    %12 = tpu.matmul %10, %8, %cst_13 {dimension_numbers = #tpu.dot_dimension_numbers<[1], [0], [0], [1], [0, 0, 1, 1], [], []>} : vector<4x4xf32>, vector<4x128xf32>, vector<4x128xf32> -> vector<4x128xf32>
    %c1_14 = arith.constant 1 : index
    %c0_15 = arith.constant 0 : index
    %c0_16 = arith.constant 0 : index
    %13 = vector.load %arg4[%c1_14, %c0_15, %c0_16] : memref<8x4x128xf32, #tpu.memory_space<vmem>>, vector<1x4x128xf32>
    %14 = vector.shape_cast %13 : vector<1x4x128xf32> to vector<4x128xf32>
    %15 = arith.addf %12, %14 : vector<4x128xf32>
    %c2 = arith.constant 2 : index
    %c0_17 = arith.constant 0 : index
    %c0_18 = arith.constant 0 : index
    %16 = vector.load %arg3[%c2, %c0_17, %c0_18] : memref<8x4x4xf32, #tpu.memory_space<vmem>>, vector<1x4x4xf32>
    %17 = vector.shape_cast %16 : vector<1x4x4xf32> to vector<4x4xf32>
    %cst_19 = arith.constant dense<0.000000e+00> : vector<4x16xf32>
    %18 = tpu.matmul %17, %11, %cst_19 {dimension_numbers = #tpu.dot_dimension_numbers<[1], [0], [0], [1], [0, 0, 1, 1], [], []>} : vector<4x4xf32>, vector<4x16xf32>, vector<4x16xf32> -> vector<4x16xf32>
    %cst_20 = arith.constant dense<0.000000e+00> : vector<4x128xf32>
    %19 = tpu.matmul %17, %15, %cst_20 {dimension_numbers = #tpu.dot_dimension_numbers<[1], [0], [0], [1], [0, 0, 1, 1], [], []>} : vector<4x4xf32>, vector<4x128xf32>, vector<4x128xf32> -> vector<4x128xf32>
    %c2_21 = arith.constant 2 : index
    %c0_22 = arith.constant 0 : index
    %c0_23 = arith.constant 0 : index
    %20 = vector.load %arg4[%c2_21, %c0_22, %c0_23] : memref<8x4x128xf32, #tpu.memory_space<vmem>>, vector<1x4x128xf32>
    %21 = vector.shape_cast %20 : vector<1x4x128xf32> to vector<4x128xf32>
    %22 = arith.addf %19, %21 : vector<4x128xf32>
    %c3 = arith.constant 3 : index
    %c0_24 = arith.constant 0 : index
    %c0_25 = arith.constant 0 : index
    %23 = vector.load %arg3[%c3, %c0_24, %c0_25] : memref<8x4x4xf32, #tpu.memory_space<vmem>>, vector<1x4x4xf32>
    %24 = vector.shape_cast %23 : vector<1x4x4xf32> to vector<4x4xf32>
    %cst_26 = arith.constant dense<0.000000e+00> : vector<4x16xf32>
    %25 = tpu.matmul %24, %18, %cst_26 {dimension_numbers = #tpu.dot_dimension_numbers<[1], [0], [0], [1], [0, 0, 1, 1], [], []>} : vector<4x4xf32>, vector<4x16xf32>, vector<4x16xf32> -> vector<4x16xf32>
    %cst_27 = arith.constant dense<0.000000e+00> : vector<4x128xf32>
    %26 = tpu.matmul %24, %22, %cst_27 {dimension_numbers = #tpu.dot_dimension_numbers<[1], [0], [0], [1], [0, 0, 1, 1], [], []>} : vector<4x4xf32>, vector<4x128xf32>, vector<4x128xf32> -> vector<4x128xf32>
    %c3_28 = arith.constant 3 : index
    %c0_29 = arith.constant 0 : index
    %c0_30 = arith.constant 0 : index
    %27 = vector.load %arg4[%c3_28, %c0_29, %c0_30] : memref<8x4x128xf32, #tpu.memory_space<vmem>>, vector<1x4x128xf32>
    %28 = vector.shape_cast %27 : vector<1x4x128xf32> to vector<4x128xf32>
    %29 = arith.addf %26, %28 : vector<4x128xf32>
    %c4 = arith.constant 4 : index
    %c0_31 = arith.constant 0 : index
    %c0_32 = arith.constant 0 : index
    %30 = vector.load %arg3[%c4, %c0_31, %c0_32] : memref<8x4x4xf32, #tpu.memory_space<vmem>>, vector<1x4x4xf32>
    %31 = vector.shape_cast %30 : vector<1x4x4xf32> to vector<4x4xf32>
    %cst_33 = arith.constant dense<0.000000e+00> : vector<4x16xf32>
    %32 = tpu.matmul %31, %25, %cst_33 {dimension_numbers = #tpu.dot_dimension_numbers<[1], [0], [0], [1], [0, 0, 1, 1], [], []>} : vector<4x4xf32>, vector<4x16xf32>, vector<4x16xf32> -> vector<4x16xf32>
    %cst_34 = arith.constant dense<0.000000e+00> : vector<4x128xf32>
    %33 = tpu.matmul %31, %29, %cst_34 {dimension_numbers = #tpu.dot_dimension_numbers<[1], [0], [0], [1], [0, 0, 1, 1], [], []>} : vector<4x4xf32>, vector<4x128xf32>, vector<4x128xf32> -> vector<4x128xf32>
    %c4_35 = arith.constant 4 : index
    %c0_36 = arith.constant 0 : index
    %c0_37 = arith.constant 0 : index
    %34 = vector.load %arg4[%c4_35, %c0_36, %c0_37] : memref<8x4x128xf32, #tpu.memory_space<vmem>>, vector<1x4x128xf32>
    %35 = vector.shape_cast %34 : vector<1x4x128xf32> to vector<4x128xf32>
    %36 = arith.addf %33, %35 : vector<4x128xf32>
    %c5 = arith.constant 5 : index
    %c0_38 = arith.constant 0 : index
    %c0_39 = arith.constant 0 : index
    %37 = vector.load %arg3[%c5, %c0_38, %c0_39] : memref<8x4x4xf32, #tpu.memory_space<vmem>>, vector<1x4x4xf32>
    %38 = vector.shape_cast %37 : vector<1x4x4xf32> to vector<4x4xf32>
    %cst_40 = arith.constant dense<0.000000e+00> : vector<4x16xf32>
    %39 = tpu.matmul %38, %32, %cst_40 {dimension_numbers = #tpu.dot_dimension_numbers<[1], [0], [0], [1], [0, 0, 1, 1], [], []>} : vector<4x4xf32>, vector<4x16xf32>, vector<4x16xf32> -> vector<4x16xf32>
    %cst_41 = arith.constant dense<0.000000e+00> : vector<4x128xf32>
    %40 = tpu.matmul %38, %36, %cst_41 {dimension_numbers = #tpu.dot_dimension_numbers<[1], [0], [0], [1], [0, 0, 1, 1], [], []>} : vector<4x4xf32>, vector<4x128xf32>, vector<4x128xf32> -> vector<4x128xf32>
    %c5_42 = arith.constant 5 : index
    %c0_43 = arith.constant 0 : index
    %c0_44 = arith.constant 0 : index
    %41 = vector.load %arg4[%c5_42, %c0_43, %c0_44] : memref<8x4x128xf32, #tpu.memory_space<vmem>>, vector<1x4x128xf32>
    %42 = vector.shape_cast %41 : vector<1x4x128xf32> to vector<4x128xf32>
    %43 = arith.addf %40, %42 : vector<4x128xf32>
    %c6 = arith.constant 6 : index
    %c0_45 = arith.constant 0 : index
    %c0_46 = arith.constant 0 : index
    %44 = vector.load %arg3[%c6, %c0_45, %c0_46] : memref<8x4x4xf32, #tpu.memory_space<vmem>>, vector<1x4x4xf32>
    %45 = vector.shape_cast %44 : vector<1x4x4xf32> to vector<4x4xf32>
    %cst_47 = arith.constant dense<0.000000e+00> : vector<4x16xf32>
    %46 = tpu.matmul %45, %39, %cst_47 {dimension_numbers = #tpu.dot_dimension_numbers<[1], [0], [0], [1], [0, 0, 1, 1], [], []>} : vector<4x4xf32>, vector<4x16xf32>, vector<4x16xf32> -> vector<4x16xf32>
    %cst_48 = arith.constant dense<0.000000e+00> : vector<4x128xf32>
    %47 = tpu.matmul %45, %43, %cst_48 {dimension_numbers = #tpu.dot_dimension_numbers<[1], [0], [0], [1], [0, 0, 1, 1], [], []>} : vector<4x4xf32>, vector<4x128xf32>, vector<4x128xf32> -> vector<4x128xf32>
    %c6_49 = arith.constant 6 : index
    %c0_50 = arith.constant 0 : index
    %c0_51 = arith.constant 0 : index
    %48 = vector.load %arg4[%c6_49, %c0_50, %c0_51] : memref<8x4x128xf32, #tpu.memory_space<vmem>>, vector<1x4x128xf32>
    %49 = vector.shape_cast %48 : vector<1x4x128xf32> to vector<4x128xf32>
    %50 = arith.addf %47, %49 : vector<4x128xf32>
    %c7 = arith.constant 7 : index
    %c0_52 = arith.constant 0 : index
    %c0_53 = arith.constant 0 : index
    %51 = vector.load %arg3[%c7, %c0_52, %c0_53] : memref<8x4x4xf32, #tpu.memory_space<vmem>>, vector<1x4x4xf32>
    %52 = vector.shape_cast %51 : vector<1x4x4xf32> to vector<4x4xf32>
    %cst_54 = arith.constant dense<0.000000e+00> : vector<4x16xf32>
    %53 = tpu.matmul %52, %46, %cst_54 {dimension_numbers = #tpu.dot_dimension_numbers<[1], [0], [0], [1], [0, 0, 1, 1], [], []>} : vector<4x4xf32>, vector<4x16xf32>, vector<4x16xf32> -> vector<4x16xf32>
    %cst_55 = arith.constant dense<0.000000e+00> : vector<4x128xf32>
    %54 = tpu.matmul %52, %50, %cst_55 {dimension_numbers = #tpu.dot_dimension_numbers<[1], [0], [0], [1], [0, 0, 1, 1], [], []>} : vector<4x4xf32>, vector<4x128xf32>, vector<4x128xf32> -> vector<4x128xf32>
    %c7_56 = arith.constant 7 : index
    %c0_57 = arith.constant 0 : index
    %c0_58 = arith.constant 0 : index
    %55 = vector.load %arg4[%c7_56, %c0_57, %c0_58] : memref<8x4x128xf32, #tpu.memory_space<vmem>>, vector<1x4x128xf32>
    %56 = vector.shape_cast %55 : vector<1x4x128xf32> to vector<4x128xf32>
    %57 = arith.addf %54, %56 : vector<4x128xf32>
    %c0_59 = arith.constant 0 : index
    %c0_60 = arith.constant 0 : index
    %58 = vector.load %arg5[%c0_59, %c0_60] : memref<16x128xf32, #tpu.memory_space<vmem>>, vector<16x128xf32>
    %cst_61 = arith.constant dense<0.000000e+00> : vector<4x128xf32>
    %59 = tpu.matmul %53, %58, %cst_61 {dimension_numbers = #tpu.dot_dimension_numbers<[1], [0], [0], [1], [0, 0, 1, 1], [], []>} : vector<4x16xf32>, vector<16x128xf32>, vector<4x128xf32> -> vector<4x128xf32>
    %60 = vector.extract_strided_slice %57 {offsets = [0, 0], sizes = [4, 1], strides = [1, 1]} : vector<4x128xf32> to vector<4x1xf32>
    %61 = vector.broadcast %60 : vector<4x1xf32> to vector<4x128xf32>
    %62 = arith.addf %59, %61 : vector<4x128xf32>
    %c0_62 = arith.constant 0 : index
    %c0_63 = arith.constant 0 : index
    %63 = vector.load %arg6[%c0_62, %c0_63] : memref<4x128xf32, #tpu.memory_space<vmem>>, vector<4x128xf32>
    tpu.vector_store %arg6[%c0_62, %c0_63], %62 {strides = array<i32>} : memref<4x128xf32, #tpu.memory_space<vmem>>, vector<4x128xf32>,
    return
  }
  func.func @transform_0(%arg0: i32) -> (i32, i32) {
    %c0_i32 = arith.constant 0 : i32
    %c0_i32_0 = arith.constant 0 : i32
    %c0_i32_1 = arith.constant 0 : i32
    return %c0_i32, %c0_i32_0 : i32, i32
  }
  func.func @transform_1(%arg0: i32) -> (i32, i32) {
    %c0_i32 = arith.constant 0 : i32
    %c0_i32_0 = arith.constant 0 : i32
    %c0_i32_1 = arith.constant 0 : i32
    return %c0_i32, %c0_i32_0 : i32, i32
  }
  func.func @transform_2(%arg0: i32) -> (i32, i32, i32) {
    %c0_i32 = arith.constant 0 : i32
    %c0_i32_0 = arith.constant 0 : i32
    %c0_i32_1 = arith.constant 0 : i32
    %c0_i32_2 = arith.constant 0 : i32
    return %c0_i32, %c0_i32_0, %c0_i32_1 : i32, i32, i32
  }
  func.func @transform_3(%arg0: i32) -> (i32, i32, i32) {
    %c0_i32 = arith.constant 0 : i32
    %c0_i32_0 = arith.constant 0 : i32
    %c0_i32_1 = arith.constant 0 : i32
    %c0_i32_2 = arith.constant 0 : i32
    return %c0_i32, %c0_i32_0, %c0_i32_1 : i32, i32, i32
  }
  func.func @transform_4(%arg0: i32) -> (i32, i32) {
    %c0_i32 = arith.constant 0 : i32
    %c0_i32_0 = arith.constant 0 : i32
    return %c0_i32, %arg0 : i32, i32
  }
  func.func @transform_5(%arg0: i32) -> (i32, i32) {
    %c0_i32 = arith.constant 0 : i32
    %c0_i32_0 = arith.constant 0 : i32
    return %c0_i32, %arg0 : i32, i32
  }
}

</mosaic_0001>

<bundles_post_ra>
// kernel: toy_model_forward.1
= control target key start
LH: loop header
LB: loop body
LE: loop exit
PB: predicated region body
PF: predicated region fallthrough
CT: control target
= control target key end

     0   :  { %vm27_vm0 = vcmask 1043456   ;;  %vm23_vm1 = vcmask 31744   ;;  %v1509_v0 = vmov 0.0   ;;  %vm1510_vm2 = vmmov 0   ;;  %s1688_s0 = inlined_call_operand.vmem [shape: f32[4,16], index: 0, kind: input, shape index: {}]   ;;  %s1689_s2 = inlined_call_operand.vmem [shape: f32[8,4,4], index: 2, kind: input, shape index: {}]   ;;  %s1690_s1 = inlined_call_operand.vmem [shape: f32[4,128], index: 1, kind: input, shape index: {}]   ;;  %s1691_s3 = inlined_call_operand.vmem [shape: f32[8,4,128], index: 3, kind: input, shape index: {}]   ;;  %s1692_s4 = inlined_call_operand.vmem [shape: f32[16,128], index: 4, kind: input, shape index: {}]   ;;  %s1693_s5 = inlined_call_operand.vmem [shape: f32[4,128], index: 5, kind: output, shape index: {}]  }
   0x1   :  { %1414 = vmatprep.subr.mxu0 %v1509_v0  ;;  %v20_v1 = vld [vmem:[%s1688_s0] sm:$0xf]  ;;  %1416 = vmatprep.mubr.msk.f32.mxu0 %vm1510_vm2, %v1509_v0  ;;  %v1336_v4 = vld [vmem:[%s1689_s2 + $0x4] sm:$0xf]  ;;  %v1342_v11 = vld [vmem:[%s1689_s2 + $0x8] sm:$0xf] }
   0x2   :  { %v22_v2 = vld [vmem:[%s1689_s2] sm:$0xf]  ;;  %1415 = vmatpush3.msk.msra.mxu0 %vm27_vm0, %v20_v1  ;;  %1419 = vmatprep.subr.mxu1 %v1509_v0  ;;  %v1339_v14 = vld [vmem:[%s1691_s3 + $0x4] sm:$0xf]  ;;  %v1348_v18 = vld [vmem:[%s1689_s2 + $0xc] sm:$0xf] }
   0x3   :  { %v21_v3 = vld [vmem:[%s1690_s1] sm:$0xf]  ;;  %1417 = vmatmul.mubr.msk.f32.vlgmr.msra.gmra.mrb[0].mxu0 %vm23_vm1, %v22_v2  ;;  %1421 = vmatprep.mubr.msk.f32.mxu1 %vm1510_vm2, %v1509_v0  ;;  %v1345_v21 = vld [vmem:[%s1691_s3 + $0x8] sm:$0xf]  ;;  %v1354_v25 = vld [vmem:[%s1689_s2 + $0x10] sm:$0xf] }
   0x4   :  { %1420 = vmatpush3.msk.msra.mxu1 %vm27_vm0, %v21_v3  ;;  %1424 = vmatprep.subr.mxu0 %v1509_v0  ;;  %v101_v6 = vld [vmem:[%s1691_s3] sm:$0xf]  ;;  %v1351_v28 = vld [vmem:[%s1691_s3 + $0xc] sm:$0xf]  ;;  %v1360_v32 = vld [vmem:[%s1689_s2 + $0x14] sm:$0xf] }
   0x5   :  { %1422 = vmatmul.mubr.msk.f32.vlgmr.msra.gmra.mrb[0].mxu1 %vm23_vm1, %v22_v2  ;;  %1426 = vmatprep.mubr.msk.f32.mxu0 %vm1510_vm2, %v1509_v0  ;;  %v1357_v35 = vld [vmem:[%s1691_s3 + $0x10] sm:$0xf]  ;;  %v1366_v39 = vld [vmem:[%s1689_s2 + $0x18] sm:$0xf]  ;;  %v1363_v42 = vld [vmem:[%s1691_s3 + $0x14] sm:$0xf] }
   0x6   :  { %1429 = vmatprep.subr.mxu1 %v1509_v0  ;;  %1431 = vmatprep.mubr.msk.f32.mxu1 %vm1510_vm2, %v1509_v0  ;;  %v1246_v46 = vld [vmem:[%s1692_s4] sm:$0xff]  ;;  %v1247_v47 = vld [vmem:[%s1692_s4 + $0x8] sm:$0xff]  ;;  %v1372_v48 = vld [vmem:[%s1689_s2 + $0x1c] sm:$0xf]  ;;  %v1511_v52 = vmov 0.0|0.0   ;;  %v1512_v57 = vmov 0  }
   0x7   :  { %v1502_v49 = vpack.c.bf16 %v1247_v47, %v1246_v46  ;;  %v1369_v53 = vld [vmem:[%s1691_s3 + $0x18] sm:$0xf]  ;;  %1508 = vset.pattern.permute.xlu0 %v1512_v57  ;;  %vm1253_vm3 = vcmask 130048   ;;  %v1375_v60 = vld [vmem:[%s1691_s3 + $0x1c] sm:$0xf] }
  0xd6   :  { %v97_v5 = vpop.f32.mrb[0].mxu0 }
  0xd7   :  { %v1418_v7 = vpop.f32.mrb[1].mxu0  ;;  %1425 = vmatpush3.msk.msra.mxu0 %vm27_vm0, %v97_v5 }
  0xd8   :  { %1427 = vmatmul.mubr.msk.f32.vlgmr.msra.gmra.mrb[2].mxu0 %vm23_vm1, %v1336_v4  ;;  %v171_v8 = vpop.f32.mrb[0].mxu1  ;;  %1434 = vmatprep.subr.mxu0 %v1509_v0 }
  0xd9   :  { %v172_v9 = vadd.f32 %v171_v8, %v101_v6  ;;  %v1423_v10 = vpop.f32.mrb[1].mxu1  ;;  %1436 = vmatprep.mubr.msk.f32.mxu0 %vm1510_vm2, %v1509_v0 }
  0xdb   :  { %1430 = vmatpush3.msk.msra.mxu1 %vm27_vm0, %v172_v9 }
  0xdc   :  { %1432 = vmatmul.mubr.msk.f32.vlgmr.msra.gmra.mrb[2].mxu1 %vm23_vm1, %v1336_v4  ;;  %1439 = vmatprep.subr.mxu1 %v1509_v0 }
  0xdd   :  { %1441 = vmatprep.mubr.msk.f32.mxu1 %vm1510_vm2, %v1509_v0 }
 0x1ab   :  { %v249_v12 = vpop.f32.mrb[2].mxu0 }
 0x1ac   :  { %v1428_v13 = vpop.f32.mrb[3].mxu0  ;;  %1435 = vmatpush3.msk.msra.mxu0 %vm27_vm0, %v249_v12 }
 0x1ad   :  { %1437 = vmatmul.mubr.msk.f32.vlgmr.msra.gmra.mrb[4].mxu0 %vm23_vm1, %v1342_v11  ;;  %1444 = vmatprep.subr.mxu0 %v1509_v0 }
 0x1ae   :  { %1446 = vmatprep.mubr.msk.f32.mxu0 %vm1510_vm2, %v1509_v0 }
 0x1af   :  { %v324_v15 = vpop.f32.mrb[2].mxu1 }
 0x1b0   :  { %v325_v16 = vadd.f32 %v1339_v14, %v324_v15  ;;  %v1433_v17 = vpop.f32.mrb[3].mxu1 }
 0x1b2   :  { %1440 = vmatpush3.msk.msra.mxu1 %vm27_vm0, %v325_v16 }
 0x1b3   :  { %1442 = vmatmul.mubr.msk.f32.vlgmr.msra.gmra.mrb[4].mxu1 %vm23_vm1, %v1342_v11  ;;  %1449 = vmatprep.subr.mxu1 %v1509_v0 }
 0x1b4   :  { %1451 = vmatprep.mubr.msk.f32.mxu1 %vm1510_vm2, %v1509_v0 }
 0x280   :  { %v402_v19 = vpop.f32.mrb[4].mxu0 }
 0x281   :  { %v1438_v20 = vpop.f32.mrb[5].mxu0  ;;  %1445 = vmatpush3.msk.msra.mxu0 %vm27_vm0, %v402_v19 }
 0x282   :  { %1447 = vmatmul.mubr.msk.f32.vlgmr.msra.gmra.mrb[6].mxu0 %vm23_vm1, %v1348_v18  ;;  %1454 = vmatprep.subr.mxu0 %v1509_v0 }
 0x283   :  { %1456 = vmatprep.mubr.msk.f32.mxu0 %vm1510_vm2, %v1509_v0 }
 0x286   :  { %v477_v22 = vpop.f32.mrb[4].mxu1 }
 0x287   :  { %v478_v23 = vadd.f32 %v1345_v21, %v477_v22  ;;  %v1443_v24 = vpop.f32.mrb[5].mxu1 }
 0x289   :  { %1450 = vmatpush3.msk.msra.mxu1 %vm27_vm0, %v478_v23 }
 0x28a   :  { %1452 = vmatmul.mubr.msk.f32.vlgmr.msra.gmra.mrb[6].mxu1 %vm23_vm1, %v1348_v18  ;;  %1459 = vmatprep.subr.mxu1 %v1509_v0 }
 0x28b   :  { %1461 = vmatprep.mubr.msk.f32.mxu1 %vm1510_vm2, %v1509_v0 }
 0x355   :  { %v555_v26 = vpop.f32.mrb[6].mxu0 }
 0x356   :  { %v1448_v27 = vpop.f32.mrb[7].mxu0  ;;  %1455 = vmatpush3.msk.msra.mxu0 %vm27_vm0, %v555_v26 }
 0x357   :  { %1457 = vmatmul.mubr.msk.f32.vlgmr.msra.gmra.mrb[8].mxu0 %vm23_vm1, %v1354_v25  ;;  %1464 = vmatprep.subr.mxu0 %v1509_v0 }
 0x358   :  { %1466 = vmatprep.mubr.msk.f32.mxu0 %vm1510_vm2, %v1509_v0 }
 0x35d   :  { %v630_v29 = vpop.f32.mrb[6].mxu1 }
 0x35e   :  { %v631_v30 = vadd.f32 %v1351_v28, %v630_v29  ;;  %v1453_v31 = vpop.f32.mrb[7].mxu1 }
 0x360   :  { %1460 = vmatpush3.msk.msra.mxu1 %vm27_vm0, %v631_v30 }
 0x361   :  { %1462 = vmatmul.mubr.msk.f32.vlgmr.msra.gmra.mrb[8].mxu1 %vm23_vm1, %v1354_v25  ;;  %1469 = vmatprep.subr.mxu1 %v1509_v0 }
 0x362   :  { %1471 = vmatprep.mubr.msk.f32.mxu1 %vm1510_vm2, %v1509_v0 }
 0x42a   :  { %v708_v33 = vpop.f32.mrb[8].mxu0 }
 0x42b   :  { %v1458_v34 = vpop.f32.mrb[9].mxu0  ;;  %1465 = vmatpush3.msk.msra.mxu0 %vm27_vm0, %v708_v33 }
 0x42c   :  { %1467 = vmatmul.mubr.msk.f32.vlgmr.msra.gmra.mrb[10].mxu0 %vm23_vm1, %v1360_v32  ;;  %1474 = vmatprep.subr.mxu0 %v1509_v0 }
 0x42d   :  { %1476 = vmatprep.mubr.msk.f32.mxu0 %vm1510_vm2, %v1509_v0 }
 0x434   :  { %v783_v36 = vpop.f32.mrb[8].mxu1 }
 0x435   :  { %v784_v37 = vadd.f32 %v1357_v35, %v783_v36  ;;  %v1463_v38 = vpop.f32.mrb[9].mxu1 }
 0x437   :  { %1470 = vmatpush3.msk.msra.mxu1 %vm27_vm0, %v784_v37 }
 0x438   :  { %1472 = vmatmul.mubr.msk.f32.vlgmr.msra.gmra.mrb[10].mxu1 %vm23_vm1, %v1360_v32  ;;  %1479 = vmatprep.subr.mxu1 %v1509_v0 }
 0x439   :  { %1481 = vmatprep.mubr.msk.f32.mxu1 %vm1510_vm2, %v1509_v0 }
 0x4ff   :  { %v861_v40 = vpop.f32.mrb[10].mxu0 }
 0x500   :  { %v1468_v41 = vpop.f32.mrb[11].mxu0  ;;  %1475 = vmatpush3.msk.msra.mxu0 %vm27_vm0, %v861_v40 }
 0x501   :  { %1477 = vmatmul.mubr.msk.f32.vlgmr.msra.gmra.mrb[12].mxu0 %vm23_vm1, %v1366_v39  ;;  %1484 = vmatprep.subr.mxu0 %v1509_v0 }
 0x502   :  { %1486 = vmatprep.mubr.msk.f32.mxu0 %vm1510_vm2, %v1509_v0 }
 0x50b   :  { %v936_v43 = vpop.f32.mrb[10].mxu1 }
 0x50c   :  { %v937_v44 = vadd.f32 %v1363_v42, %v936_v43  ;;  %v1473_v45 = vpop.f32.mrb[11].mxu1 }
 0x50e   :  { %1480 = vmatpush3.msk.msra.mxu1 %vm27_vm0, %v937_v44 }
 0x50f   :  { %1482 = vmatmul.mubr.msk.f32.vlgmr.msra.gmra.mrb[12].mxu1 %vm23_vm1, %v1366_v39  ;;  %1489 = vmatprep.subr.mxu1 %v1509_v0 }
 0x510   :  { %1491 = vmatprep.mubr.msk.f32.mxu1 %vm1510_vm2, %v1509_v0 }
 0x5d4   :  { %v1014_v50 = vpop.f32.mrb[12].mxu0 }
 0x5d5   :  { %v1478_v51 = vpop.f32.mrb[13].mxu0  ;;  %1485 = vmatpush3.msk.msra.mxu0 %vm27_vm0, %v1014_v50 }
 0x5d6   :  { %1487 = vmatmul.mubr.msk.f32.vlgmr.msra.gmra.mrb[14].mxu0 %vm23_vm1, %v1372_v48  ;;  %1501 = vmatprep.subr.bf16.mxu0 %v1511_v52 }
 0x5d7   :  { %1503 = vmatpush3.bf16.msra.mxu0 %v1502_v49  ;;  %1498 = vmatprep.mubr.msk.f32.mxu0 %vm1510_vm2, %v1509_v0 }
 0x5e2   :  { %v1089_v54 = vpop.f32.mrb[12].mxu1 }
 0x5e3   :  { %v1090_v55 = vadd.f32 %v1369_v53, %v1089_v54  ;;  %v1483_v56 = vpop.f32.mrb[13].mxu1 }
 0x5e5   :  { %1490 = vmatpush3.msk.msra.mxu1 %vm27_vm0, %v1090_v55 }
 0x5e6   :  { %1492 = vmatmul.mubr.msk.f32.vlgmr.msra.gmra.mrb[14].mxu1 %vm23_vm1, %v1372_v48 }
 0x6a9   :  { %v1167_v58 = vpop.f32.mrb[14].mxu0 }
 0x6aa   :  { %v1488_v59 = vpop.f32.mrb[15].mxu0  ;;  %1499 = vmatmul.mubr.msk.f32.vlgmr.msra.gmra.mrb[16].mxu0 %vm1253_vm3, %v1167_v58 }
 0x6b9   :  { %v1242_v61 = vpop.f32.mrb[14].mxu1 }
 0x6ba   :  { %v1243_v62 = vadd.f32 %v1375_v60, %v1242_v61  ;;  %v1493_v63 = vpop.f32.mrb[15].mxu1 }
 0x6bc   :  { %1250 = vperm.xlu0 %1508, %v1243_v62  }
 0x73b   :  { %v1251_v0 = vpop.permute.xlu0 %1250 }
 0x77d   :  { %v1323_v1 = vpop.f32.mrb[16].mxu0 }
 0x77e   :  { %v1324_v2 = vadd.f32 %v1323_v1, %v1251_v0  ;;  %v1500_v3 = vpop.f32.mrb[17].mxu0 }
 0x780   :  { %1327 = vst [vmem:[%s1693_s5] sm:$0xf] %v1324_v2 }

</bundles_post_ra>
